<compile_context>
chip_gen: v7x
topology: tpu7x:2x2x1
jax: 0.10.0
libtpu: 0.0.40
codegen_flags: <defaults>
</compile_context>

<pallas_src>
import functools

import jax
import jax.numpy as jnp
from jax import lax
from jax.experimental import pallas as pl
from jax.experimental.pallas import tpu as pltpu


def _ce_online_kernel(pred_ref, tgt_ref, out_ref, m_sc, l_sc, t_sc, *,
                      n_total, c_total, tile_n, tile_c,
                      mask_rows, mask_cols, compute_dtype):
    # pred_ref: (TILE_N, TILE_C) logits, native storage dtype
    # tgt_ref:  (TILE_N, 1) int32 class indices
    # out_ref:  (8, 128) f32 lane-dense partial-sum block (scalar at [0, 0])
    # m_sc/l_sc/t_sc: (TILE_N, 1) f32 running max / exp-sum / target logit
    ri = pl.program_id(0)
    ci = pl.program_id(1)
    num_c = pl.num_programs(1)

    @pl.when(ci == 0)
    def _init():
        m_sc[...] = jnp.full(m_sc.shape, -1e30, dtype=jnp.float32)
        l_sc[...] = jnp.zeros(l_sc.shape, dtype=jnp.float32)
        t_sc[...] = jnp.zeros(t_sc.shape, dtype=jnp.float32)

    # Elementwise (T, C) work stays in the compute dtype (bf16 for bf16
    # inputs, f32 otherwise); accumulation is always f32.
    logits = pred_ref[...].astype(compute_dtype)            # (T, TC)
    tgt = tgt_ref[...]                                       # (T, 1) int32
    t, tc = logits.shape

    col_ids = ci * tile_c + lax.broadcasted_iota(jnp.int32, (t, tc), 1)

    if mask_cols:
        # Columns past the true C (padded last C tile) -> very negative so
        # exp() -> 0 and they never win the running max.
        logits = jnp.where(col_ids < c_total, logits,
                           jnp.asarray(-1e30, dtype=compute_dtype))
    row_valid = None
    if mask_rows:
        # Rows past the true N (padded last row tile) -> 0 so every value the
        # exp/log path sees is finite regardless of what the padded HBM holds.
        row_ids = ri * tile_n + lax.broadcasted_iota(jnp.int32, (t, 1), 0)
        row_valid = row_ids < n_total                        # (T, 1) bool
        logits = jnp.where(row_valid, logits,
                           jnp.asarray(0.0, dtype=compute_dtype))

    # --- Online softmax update (f32 running statistics). ---
    tile_max = jnp.max(logits, axis=1, keepdims=True).astype(jnp.float32)
    m_prev = m_sc[...]
    m_new = jnp.maximum(m_prev, tile_max)                    # (T, 1) f32
    alpha = jnp.exp(m_prev - m_new)                          # (T, 1) f32

    # m_new is exactly representable in the compute dtype (it is a max of
    # compute-dtype values), so this cast introduces no inconsistency.
    shifted = logits - m_new.astype(compute_dtype)           # (T, TC)
    p = jnp.exp(shifted)                                     # (T, TC) EUP
    tile_sum = jnp.sum(p, axis=1, keepdims=True, dtype=jnp.float32)

    l_sc[...] = alpha * l_sc[...] + tile_sum
    m_sc[...] = m_new

    # Raw (unshifted) target logit; the target class lands in exactly one
    # C tile, so a plain f32 accumulation is exact.
    t_hit = jnp.where(col_ids == tgt, logits,
                      jnp.asarray(0.0, dtype=compute_dtype))
    t_sc[...] = t_sc[...] + jnp.sum(t_hit, axis=1, keepdims=True,
                                    dtype=jnp.float32)

    @pl.when(ci == num_c - 1)
    def _finalize():
        lse = m_sc[...] + jnp.log(l_sc[...])                 # (T, 1) f32
        losses = lse - t_sc[...]                             # (T, 1)
        if mask_rows:
            losses = jnp.where(row_valid, losses, 0.0)
        s = jnp.sum(losses)                                  # scalar partial

        # Lane-dense, unmasked full-block store: scalar at [0, 0], zeros else.
        sub = lax.broadcasted_iota(jnp.int32, (8, 128), 0)
        lane = lax.broadcasted_iota(jnp.int32, (8, 128), 1)
        out_ref[...] = jnp.where((sub == 0) & (lane == 0), s, 0.0)


def cross_entropy_mean(predictions, targets, *, tile_n=None, tile_c=None):
    """predictions: (N, C) float logits (f32 or bf16); targets: (N,) ints."""
    n, c = predictions.shape
    in_item = jnp.dtype(predictions.dtype).itemsize

    # bf16 inputs -> bf16 on-tile elementwise compute (native on v6e/v7x,
    # legalized on v5e), f32 accumulation.  Everything else computes in f32.
    compute_dtype = (jnp.bfloat16 if predictions.dtype == jnp.bfloat16
                     else jnp.float32)
    c_item = jnp.dtype(compute_dtype).itemsize

    # --- VMEM budget: derived from the actual chip so v7x (64 MiB/TC) gets a
    # conservative limit while v5e/v6e (128 MiB) get bigger tiles. ---
    try:
        vmem_cap = int(pltpu.get_tpu_info().vmem_capacity_bytes)
    except Exception:
        vmem_cap = 64 * 1024 * 1024          # conservative (v7x per-TC VMEM)
    vmem_limit = min((vmem_cap * 3) // 4, 112 * 1024 * 1024)
    budget = vmem_limit - 6 * 1024 * 1024    # headroom: scratch, partials, etc.

    # Per-element working set: double-buffered input DMA + a handful of
    # (T, TC) intermediates (iota/compare in i32, shifted/exp in compute dtype,
    # f32-accumulated reduce operand).  Deliberately conservative.
    per_elem = 2 * in_item + 4 * 4 + 3 * c_item

    n_pad8 = max(8, ((n + 7) // 8) * 8)

    if tile_c is None:
        if c * per_elem * 512 <= budget:
            # Whole class axis fits with >=512-row tiles: single C tile.
            tile_c = c
        else:
            # Large vocab: tile the class axis (multiple of 128) and keep
            # ~512-row tiles so the online-softmax scratch stays tiny.
            tile_c = max(128, ((budget // (512 * per_elem)) // 128) * 128)
            tile_c = min(tile_c, ((c + 127) // 128) * 128)
    if tile_n is None:
        tile_n = budget // (tile_c * per_elem)
        tile_n = int(max(8, min(4096, (tile_n // 8) * 8)))
    tile_n = int(max(8, (min(tile_n, n_pad8) // 8) * 8))
    tile_c = int(tile_c)

    num_row_tiles = pl.cdiv(n, tile_n)
    num_c_tiles = pl.cdiv(c, tile_c)

    mask_rows = (n % tile_n) != 0
    mask_cols = (c % tile_c) != 0

    tgt_2d = targets.astype(jnp.int32).reshape(n, 1)

    kernel = functools.partial(
        _ce_online_kernel,
        n_total=n, c_total=c, tile_n=tile_n, tile_c=tile_c,
        mask_rows=mask_rows, mask_cols=mask_cols, compute_dtype=compute_dtype)

    cost = pl.CostEstimate(
        flops=6 * n * c,
        transcendentals=n * c,
        bytes_accessed=n * c * in_item + n * 4 + num_row_tiles * 8 * 128 * 4,
    )

    partials = pl.pallas_call(
        kernel,
        out_shape=jax.ShapeDtypeStruct((num_row_tiles * 8, 128), jnp.float32),
        grid_spec=pltpu.PrefetchScalarGridSpec(
            num_scalar_prefetch=0,
            grid=(num_row_tiles, num_c_tiles),
            in_specs=[
                pl.BlockSpec((tile_n, tile_c), lambda i, ci: (i, ci)),
                pl.BlockSpec((tile_n, 1), lambda i, ci: (i, 0)),
            ],
            out_specs=pl.BlockSpec((8, 128), lambda i, ci: (i, 0)),
            scratch_shapes=[
                pltpu.VMEM((tile_n, 1), jnp.float32),   # running max
                pltpu.VMEM((tile_n, 1), jnp.float32),   # running exp-sum
                pltpu.VMEM((tile_n, 1), jnp.float32),   # running target logit
            ],
        ),
        compiler_params=pltpu.CompilerParams(
            dimension_semantics=("parallel", "arbitrary"),
            vmem_limit_bytes=int(vmem_limit),
        ),
        cost_estimate=cost,
    )(predictions, tgt_2d)

    # Final ~KB-sized reduction + mean over the GLOBAL N in plain JAX.
    return jnp.sum(partials) / jnp.float32(n)


if __name__ == "__main__":
    key = jax.random.PRNGKey(0)
    k1, k2, k3, k4 = jax.random.split(key, 4)

    def ref_ce(preds, tgts):
        lp = jax.nn.log_softmax(preds.astype(jnp.float32), axis=-1)
        return -jnp.mean(lp[jnp.arange(preds.shape[0]), tgts])

    # Test 1: single-C-tile path; N not a multiple of the row tile.
    N1, C1 = 20, 40
    p1 = jax.random.normal(k1, (N1, C1), dtype=jnp.float32)
    t1 = jax.random.randint(k2, (N1,), 0, C1, dtype=jnp.int32)
    out1 = cross_entropy_mean(p1, t1, tile_n=8)
    jax.block_until_ready(out1)
    assert jnp.allclose(out1, ref_ce(p1, t1), rtol=1e-5, atol=1e-5), (
        out1, ref_ce(p1, t1))

    # Test 1b: auto tile selection path.
    out1b = cross_entropy_mean(p1, t1)
    jax.block_until_ready(out1b)
    assert jnp.allclose(out1b, ref_ce(p1, t1), rtol=1e-5, atol=1e-5), (
        out1b, ref_ce(p1, t1))

    # Test 2: multi-C-tile online-softmax path with a partial last C tile.
    N2, C2 = 20, 200
    p2 = jax.random.normal(k3, (N2, C2), dtype=jnp.float32) * 3.0
    t2 = jax.random.randint(k4, (N2,), 0, C2, dtype=jnp.int32)
    out2 = cross_entropy_mean(p2, t2, tile_n=8, tile_c=128)
    jax.block_until_ready(out2)
    assert jnp.allclose(out2, ref_ce(p2, t2), rtol=1e-5, atol=1e-5), (
        out2, ref_ce(p2, t2))

    # Test 3: bf16 storage + bf16 on-tile compute (f32 accumulation).
    p3 = p2.astype(jnp.bfloat16)
    out3 = cross_entropy_mean(p3, t2, tile_n=8, tile_c=128)
    jax.block_until_ready(out3)
    assert jnp.allclose(out3, ref_ce(p3, t2), rtol=5e-2, atol=5e-2), (
        out3, ref_ce(p3, t2))

    print("KERNEL_OK")
</pallas_src>

<mosaic_0001>
module attributes {stable_mosaic.version = 11 : i64} {
  func.func @_ce_online_kernel(%arg0: i32, %arg1: i32, %arg2: memref<8x40xf32, #tpu.memory_space<vmem>>, %arg3: memref<8x1xi32, #tpu.memory_space<vmem>>, %arg4: memref<8x128xf32, #tpu.memory_space<vmem>>, %arg5: memref<8x1xf32, #tpu.memory_space<vmem>>, %arg6: memref<8x1xf32, #tpu.memory_space<vmem>>, %arg7: memref<8x1xf32, #tpu.memory_space<vmem>>) attributes {dimension_semantics = [#tpu.dimension_semantics<parallel>, #tpu.dimension_semantics<arbitrary>], iteration_bounds = array<i64: 3, 1>, scalar_prefetch = 0 : i64, scratch_operands = 3 : i64, tpu.core_type = #tpu.core_type<tc>, window_params = [{transform_indices = @transform_0, window_bounds = array<i64: 8, 40>}, {transform_indices = @transform_1, window_bounds = array<i64: 8, 1>}, {transform_indices = @transform_2, window_bounds = array<i64: 8, 128>}]} {
    %c0_i32 = arith.constant 0 : i32
    %0 = arith.cmpi eq, %arg1, %c0_i32 : i32
    %1 = arith.extui %0 : i1 to i32
    %c0_i32_0 = arith.constant 0 : i32
    %2 = arith.cmpi ne, %1, %c0_i32_0 : i32
    scf.if %2 {
      %cst_22 = arith.constant -1.000000e+30 : f32
      %47 = vector.broadcast %cst_22 : f32 to vector<8x1xf32>
      %c0_23 = arith.constant 0 : index
      %c0_24 = arith.constant 0 : index
      %48 = vector.load %arg5[%c0_23, %c0_24] : memref<8x1xf32, #tpu.memory_space<vmem>>, vector<8x1xf32>
      tpu.vector_store %arg5[%c0_23, %c0_24], %47 {strides = array<i32>} : memref<8x1xf32, #tpu.memory_space<vmem>>, vector<8x1xf32>,
      %cst_25 = arith.constant 0.000000e+00 : f32
      %49 = vector.broadcast %cst_25 : f32 to vector<8x1xf32>
      %c0_26 = arith.constant 0 : index
      %c0_27 = arith.constant 0 : index
      %50 = vector.load %arg6[%c0_26, %c0_27] : memref<8x1xf32, #tpu.memory_space<vmem>>, vector<8x1xf32>
      tpu.vector_store %arg6[%c0_26, %c0_27], %49 {strides = array<i32>} : memref<8x1xf32, #tpu.memory_space<vmem>>, vector<8x1xf32>,
      %cst_28 = arith.constant 0.000000e+00 : f32
      %51 = vector.broadcast %cst_28 : f32 to vector<8x1xf32>
      %c0_29 = arith.constant 0 : index
      %c0_30 = arith.constant 0 : index
      %52 = vector.load %arg7[%c0_29, %c0_30] : memref<8x1xf32, #tpu.memory_space<vmem>>, vector<8x1xf32>
      tpu.vector_store %arg7[%c0_29, %c0_30], %51 {strides = array<i32>} : memref<8x1xf32, #tpu.memory_space<vmem>>, vector<8x1xf32>,
    } else {
    }
    %c0 = arith.constant 0 : index
    %c0_1 = arith.constant 0 : index
    %3 = vector.load %arg2[%c0, %c0_1] : memref<8x40xf32, #tpu.memory_space<vmem>>, vector<8x40xf32>
    %c0_2 = arith.constant 0 : index
    %c0_3 = arith.constant 0 : index
    %4 = vector.load %arg3[%c0_2, %c0_3] : memref<8x1xi32, #tpu.memory_space<vmem>>, vector<8x1xi32>
    %c40_i32 = arith.constant 40 : i32
    %5 = arith.muli %arg1, %c40_i32 : i32
    %6 = tpu.iota {dimensions = array<i32: 1>} : vector<8x40xi32>
    %7 = vector.broadcast %5 : i32 to vector<8x40xi32>
    %8 = arith.addi %7, %6 : vector<8x40xi32>
    %c8_i32 = arith.constant 8 : i32
    %9 = arith.muli %arg0, %c8_i32 : i32
    %10 = tpu.iota {dimensions = array<i32: 0>} : vector<8x1xi32>
    %11 = vector.broadcast %9 : i32 to vector<8x1xi32>
    %12 = arith.addi %11, %10 : vector<8x1xi32>
    %c20_i32 = arith.constant 20 : i32
    %13 = vector.broadcast %c20_i32 : i32 to vector<8x1xi32>
    %14 = arith.cmpi slt, %12, %13 : vector<8x1xi32>
    %cst = arith.constant 0.000000e+00 : f32
    %15 = vector.shape_cast %14 : vector<8x1xi1> to vector<8x1xi1>
    %16 = vector.broadcast %15 : vector<8x1xi1> to vector<8x40xi1>
    %17 = vector.broadcast %cst : f32 to vector<8x40xf32>
    %18 = arith.select %16, %3, %17 : vector<8x40xi1>, vector<8x40xf32>
    %cst_4 = arith.constant dense<0xFF800000> : vector<8xf32>
    %19 = vector.multi_reduction <maximumf>, %18, %cst_4 [1] : vector<8x40xf32> to vector<8xf32>
    %20 = vector.shape_cast %19 : vector<8xf32> to vector<8x1xf32>
    %c0_5 = arith.constant 0 : index
    %c0_6 = arith.constant 0 : index
    %21 = vector.load %arg5[%c0_5, %c0_6] : memref<8x1xf32, #tpu.memory_space<vmem>>, vector<8x1xf32>
    %22 = arith.maximumf %21, %20 : vector<8x1xf32>
    %23 = arith.subf %21, %22 : vector<8x1xf32>
    %24 = math.exp %23 : vector<8x1xf32>
    %25 = vector.broadcast %22 : vector<8x1xf32> to vector<8x40xf32>
    %26 = arith.subf %18, %25 : vector<8x40xf32>
    %27 = math.exp %26 : vector<8x40xf32>
    %cst_7 = arith.constant dense<0.000000e+00> : vector<8xf32>
    %28 = vector.multi_reduction <add>, %27, %cst_7 [1] : vector<8x40xf32> to vector<8xf32>
    %29 = vector.shape_cast %28 : vector<8xf32> to vector<8x1xf32>
    %c0_8 = arith.constant 0 : index
    %c0_9 = arith.constant 0 : index
    %30 = vector.load %arg6[%c0_8, %c0_9] : memref<8x1xf32, #tpu.memory_space<vmem>>, vector<8x1xf32>
    %31 = arith.mulf %24, %30 : vector<8x1xf32>
    %32 = arith.addf %31, %29 : vector<8x1xf32>
    %c0_10 = arith.constant 0 : index
    %c0_11 = arith.constant 0 : index
    %33 = vector.load %arg6[%c0_10, %c0_11] : memref<8x1xf32, #tpu.memory_space<vmem>>, vector<8x1xf32>
    tpu.vector_store %arg6[%c0_10, %c0_11], %32 {strides = array<i32>} : memref<8x1xf32, #tpu.memory_space<vmem>>, vector<8x1xf32>,
    %c0_12 = arith.constant 0 : index
    %c0_13 = arith.constant 0 : index
    %34 = vector.load %arg5[%c0_12, %c0_13] : memref<8x1xf32, #tpu.memory_space<vmem>>, vector<8x1xf32>
    tpu.vector_store %arg5[%c0_12, %c0_13], %22 {strides = array<i32>} : memref<8x1xf32, #tpu.memory_space<vmem>>, vector<8x1xf32>,
    %35 = vector.broadcast %4 : vector<8x1xi32> to vector<8x40xi32>
    %36 = arith.cmpi eq, %8, %35 : vector<8x40xi32>
    %cst_14 = arith.constant 0.000000e+00 : f32
    %37 = vector.broadcast %cst_14 : f32 to vector<8x40xf32>
    %38 = arith.select %36, %18, %37 : vector<8x40xi1>, vector<8x40xf32>
    %c0_15 = arith.constant 0 : index
    %c0_16 = arith.constant 0 : index
    %39 = vector.load %arg7[%c0_15, %c0_16] : memref<8x1xf32, #tpu.memory_space<vmem>>, vector<8x1xf32>
    %cst_17 = arith.constant dense<0.000000e+00> : vector<8xf32>
    %40 = vector.multi_reduction <add>, %38, %cst_17 [1] : vector<8x40xf32> to vector<8xf32>
    %41 = vector.shape_cast %40 : vector<8xf32> to vector<8x1xf32>
    %42 = arith.addf %39, %41 : vector<8x1xf32>
    %c0_18 = arith.constant 0 : index
    %c0_19 = arith.constant 0 : index
    %43 = vector.load %arg7[%c0_18, %c0_19] : memref<8x1xf32, #tpu.memory_space<vmem>>, vector<8x1xf32>
    tpu.vector_store %arg7[%c0_18, %c0_19], %42 {strides = array<i32>} : memref<8x1xf32, #tpu.memory_space<vmem>>, vector<8x1xf32>,
    %c0_i32_20 = arith.constant 0 : i32
    %44 = arith.cmpi eq, %arg1, %c0_i32_20 : i32
    %45 = arith.extui %44 : i1 to i32
    %c0_i32_21 = arith.constant 0 : i32
    %46 = arith.cmpi ne, %45, %c0_i32_21 : i32
    scf.if %46 {
      %c0_22 = arith.constant 0 : index
      %c0_23 = arith.constant 0 : index
      %47 = vector.load %arg5[%c0_22, %c0_23] : memref<8x1xf32, #tpu.memory_space<vmem>>, vector<8x1xf32>
      %c0_24 = arith.constant 0 : index
      %c0_25 = arith.constant 0 : index
      %48 = vector.load %arg6[%c0_24, %c0_25] : memref<8x1xf32, #tpu.memory_space<vmem>>, vector<8x1xf32>
      %49 = math.log %48 : vector<8x1xf32>
      %50 = arith.addf %47, %49 : vector<8x1xf32>
      %c0_26 = arith.constant 0 : index
      %c0_27 = arith.constant 0 : index
      %51 = vector.load %arg7[%c0_26, %c0_27] : memref<8x1xf32, #tpu.memory_space<vmem>>, vector<8x1xf32>
      %52 = arith.subf %50, %51 : vector<8x1xf32>
      %cst_28 = arith.constant 0.000000e+00 : f32
      %53 = vector.broadcast %cst_28 : f32 to vector<8x1xf32>
      %54 = arith.select %14, %52, %53 : vector<8x1xi1>, vector<8x1xf32>
      %55 = vector.shape_cast %54 : vector<8x1xf32> to vector<1x8x1xf32>
      %cst_29 = arith.constant dense<0.000000e+00> : vector<1xf32>
      %56 = vector.multi_reduction <add>, %55, %cst_29 [1, 2] : vector<1x8x1xf32> to vector<1xf32>
      %57 = vector.shape_cast %56 : vector<1xf32> to vector<1x1x1xf32>
      %58 = vector.extract %57[0, 0, 0] : f32 from vector<1x1x1xf32>
      %59 = tpu.iota {dimensions = array<i32: 0>} : vector<8x128xi32>
      %60 = tpu.iota {dimensions = array<i32: 1>} : vector<8x128xi32>
      %c0_i32_30 = arith.constant 0 : i32
      %61 = vector.broadcast %c0_i32_30 : i32 to vector<8x128xi32>
      %62 = arith.cmpi eq, %59, %61 : vector<8x128xi32>
      %c0_i32_31 = arith.constant 0 : i32
      %63 = vector.broadcast %c0_i32_31 : i32 to vector<8x128xi32>
      %64 = arith.cmpi eq, %60, %63 : vector<8x128xi32>
      %65 = arith.andi %62, %64 : vector<8x128xi1>
      %cst_32 = arith.constant 0.000000e+00 : f32
      %66 = vector.broadcast %58 : f32 to vector<8x128xf32>
      %67 = vector.broadcast %cst_32 : f32 to vector<8x128xf32>
      %68 = arith.select %65, %66, %67 : vector<8x128xi1>, vector<8x128xf32>
      %c0_33 = arith.constant 0 : index
      %c0_34 = arith.constant 0 : index
      %69 = vector.load %arg4[%c0_33, %c0_34] : memref<8x128xf32, #tpu.memory_space<vmem>>, vector<8x128xf32>
      tpu.vector_store %arg4[%c0_33, %c0_34], %68 {strides = array<i32>} : memref<8x128xf32, #tpu.memory_space<vmem>>, vector<8x128xf32>,
    } else {
    }
    return
  }
  func.func @transform_0(%arg0: i32, %arg1: i32) -> (i32, i32) {
    %c0_i32 = arith.constant 0 : i32
    return %arg0, %arg1 : i32, i32
  }
  func.func @transform_1(%arg0: i32, %arg1: i32) -> (i32, i32) {
    %c0_i32 = arith.constant 0 : i32
    %c0_i32_0 = arith.constant 0 : i32
    return %arg0, %c0_i32 : i32, i32
  }
  func.func @transform_2(%arg0: i32, %arg1: i32) -> (i32, i32) {
    %c0_i32 = arith.constant 0 : i32
    %c0_i32_0 = arith.constant 0 : i32
    return %arg0, %c0_i32 : i32, i32
  }
}

</mosaic_0001>

<bundles_post_ra>
// kernel: tpu_custom_call.1
= control target key start
LH: loop header
LB: loop body
LE: loop exit
PB: predicated region body
PF: predicated region fallthrough
CT: control target
= control target key end

     0   :  { %7 = vsyncpa [#allocation6], 0  ;;  %s675_s0 = inlined_call_operand.vmem [shape: f32[20,40], index: 0, kind: input, shape index: {}]   ;;  %s676_s1 = inlined_call_operand.vmem [shape: s32[20,1], index: 1, kind: input, shape index: {}]   ;;  %s677_s2 = inlined_call_operand.hbm [shape: f32[24,128], index: 2, kind: output, shape index: {}]  }
   0x1   :  { %9 = vsyncpa [#allocation6 + $0x1], 0  ;;  %s543_s9 = smov 0   ;;  %s545_s10 = smov 0  }
   0x2   :  { %s547_s11 = smov 0   ;;  %s549_s12 = smov 0  }
   0x3   :  { %s551_s13 = smov 0   ;;  %s553_s14 = smov 0  }
   0x4 LB: > { %s363_s15 = sadd.s32 4294967295, %s522_s14   ;;  %s364_s16 = sadd.s32 4294967294, %s522_s14   ;;  %s522_s14 = sphi %s553_s14, %s15_s14   ;;  %s518_s13 = sphi %s551_s13, %s684_s13   ;;  %s514_s12 = sphi %s549_s12, %s683_s12   ;;  %s510_s11 = sphi %s547_s11, %s682_s11   ;;  %s506_s10 = sphi %s545_s10, %s681_s10   ;;  %s502_s9 = sphi %s543_s9, %s680_s9  }
   0x5   : > { %s27_s17 = sadd.s32 1, %s518_s13  ;;  %s88_s18 = sadd.s32 1, %s510_s11 }
   0x6   : > { %p29_p0 = scmp.ge.s32.totalorder %s27_s17, 3  ;;  %p98_p1 = scmp.ne.s32.totalorder %s510_s11, %s506_s10 }
   0x7   : > { %p99_p2 = scmp.eq.s32.totalorder %s363_s15, 2  ;;  %p104_p3 = scmp.ne.s32.totalorder %s506_s10, %s502_s9 }
   0x8   : > { %s686_s17 = smov (%p29_p0, %s27_s17), 0  ;;  %p105_p5 = scmp.eq.s32.totalorder %s364_s16, 2 }
   0x9   : > { %p583_p4 = por %p99_p2, %p98_p1  ;;  %s85_s20 = ssub.s32 %s518_s13, %s686_s17 }
   0xa   : > { %p367_p6 = scmp.ge.s32.totalorder %s522_s14, 1  ;;  %p86_p7 = scmp.eq.s32.totalorder %s85_s20, 0 }
   0xb   : > { %p590_p8 = por %p105_p5, %p104_p3  ;;  %p140_p9 = scmp.lt.s32.totalorder %s522_s14, 4 }
   0xc   : > { %s596_s22 = scalar_select %p86_p7, %s510_s11, %s88_s18  }
   0xd   : > { %p141_p10 = pnand %p367_p6, %p140_p9 }
   0xe   : > { %p168_p11 = scmp.lt.s32.totalorder (!%p141_p10), %s514_s12, 2  ;;  %v190_v0 = vlaneseq (!%p141_p10)  ;;  %s371_s23 = sshll.u32 (!%p141_p10), %s514_s12, 3  ;;  %vm183_vm0 = vcmask (!%p141_p10), 7168   ;;  %v524_v2 = vmov (!%p141_p10), -1e+30   ;;  %vm203_vm1 = vcmask (!%p141_p10), 326656  }
   0xf   : > { %144 = sbr.rel (%p141_p10) target bundleno = 708 (0x2c4), region = 28  ;;  %v197_v1 = vstv (!%p141_p10), %s371_s23  ;;  %184 = vst.msk [vmem:[#allocation2] sm:$0xff] (!%p141_p10), %vm183_vm0, %v524_v2  ;;  %v525_v8 = vmov (!%p141_p10), 0   ;;  %v526_v10 = vmov (!%p141_p10), 0.0   ;;  %s165_s4 = sand.u32 (!%p141_p10), 1, %s506_s10  }
  0x10   : > { %v602_v3 = vshrl.u32 (!%p141_p10), %v190_v0, 7  ;;  %436 = vset.pattern.permute.xlu0 (!%p141_p10), %v525_v8  ;;  %437 = vset.pattern.permute.xlu1 (!%p141_p10), %v525_v8  ;;  %185 = vst.msk [vmem:[#allocation3] sm:$0xff] (!%p141_p10), %vm183_vm0, %v526_v10  ;;  %186 = vst.msk [vmem:[#allocation4] sm:$0xff] (!%p141_p10), %vm183_vm0, %v526_v10  ;;  %v191_v18 = vand.u32 (!%p141_p10), 127, %v190_v0  ;;  %s368_s5 = sshll.u32 (!%p141_p10), %s165_s4, 3  ;;  %s373_s6 = sshll.u32 (!%p141_p10), %s514_s12, 7 }
  0x11   : > { %s167_s7 = scalar_lea.vmem (!%p141_p10), [#allocation5], %s368_s5  ;;  %s628_s20 = scalar_lea.hbm (!%p141_p10), %s677_s2, %s373_s6 }
  0x12   : > { %v198_v4 = vadd.s32 (!%p141_p10), %v197_v1, %v602_v3  ;;  %vm261_vm4 = vcmp.eq.s32.totalorder (!%p141_p10), %v602_v3, 0  ;;  %vm262_vm5 = vcmp.eq.s32.totalorder (!%p141_p10), %v191_v18, 0  ;;  %s281_s8 = sshll.u32 (!%p141_p10), %s167_s7, 4  ;;  %s268_s23 = scalar_lea.sflag (!%p141_p10), [#allocation6], %s165_s4  ;;  %s630_s8 = int_to_ptr.vmem [resolvable:$true] %s281_s8 }
  0x13   : > { %vm263_vm6 = vmand (!%p141_p10), %vm261_vm4, %vm262_vm5 }
  0x14   : > { %vm199_vm2 = vcmp.lt.s32.totalorder (!%p141_p10), %v198_v4, 20 }
  0x16   : > { %s169_s24 = scalar_select %p168_p11, %s514_s12, 2  ;;  %v207_v11 = vld [vmem:[#allocation2] sm:$0xff] }
  0x17   : > { %v223_v26 = vld [vmem:[#allocation3] sm:$0xff]  ;;  %v234_v30 = vld [vmem:[#allocation4] sm:$0xff]  ;;  %s527_s12 = smov [#allocation5]  }
  0x18   : > { %s369_s25 = sshll.u32 %s169_s24, 3  ;;  %s444_s24 = scalar_lea.vmem %s630_s8, 128 }
  0x19   : > { %s174_s28 = scalar_lea.vmem %s675_s0, %s369_s25  ;;  %s178_s3 = scalar_lea.vmem %s676_s1, %s369_s25 }
  0x1a   : > { %v187_v5 = vld [vmem:[%s174_s28] sm:$0xff]  ;;  %p445_p12 = scmp.ne.s32.totalorder %s630_s8, %s444_s24  ;;  %s448_s25 = sshll.u32 %s527_s12, 4  ;;  %s449_s25 = int_to_ptr.vmem [resolvable:$false] %s448_s25 }
  0x1b   : > { %v202_v6 = vsel %vm199_vm2, %v187_v5, 0.0  ;;  %v188_v9 = vld [vmem:[%s178_s3] sm:$0xff]  ;;  %s450_s26 = scalar_lea.vmem %s449_s25, 256  ;;  %p451_p1 = scmp.lt.s32.totalorder %s630_s8, %s449_s25 }
  0x1c   : > { %v204_v7 = vsel %vm203_vm1, %v202_v6, -inf  ;;  %230 = vperm.xlu1 %437, %v188_v9   ;;  %p446_p13 = pnand %p445_p12, %p583_p4  ;;  %p452_p2 = scmp.lt.s32.totalorder %s450_s26, %s444_s24 }
  0x1d   : > { %205 = vmax.xlane.f32.xlu0 %v204_v7 }
  0x1e   : > { %p447_p0 = pneg %p446_p13  ;;  %p453_p3 = por %p452_p2, %p451_p1 }
  0x20   : > { %p454_p5 = pnand %p453_p3, %p447_p0 }
  0x9b   : > { %v231_v19 = vpop.permute.xlu1 %230 }
  0x9c   : > { %vm232_vm3 = vcmp.eq.s32.totalorder %v191_v18, %v231_v19 }
  0x9d   : > { %v233_v21 = vsel %vm232_vm3, %v202_v6, 0.0 }
  0x9e   : > { %v235_v23 = vsel %vm203_vm1, %v233_v21, 0.0 }
  0xaa   : > { %v206_v12 = vpop.xlane.xlu0 %205 }
  0xab   : > { %v208_v13 = vmax.f32 %v207_v11, %v206_v12 }
  0xad   : > { %v209_v14 = vsub.f32 %v207_v11, %v208_v13  ;;  %228 = vst.msk [vmem:[#allocation2] sm:$0xff] %vm183_vm0, %v208_v13  ;;  %214 = vperm.xlu0 %436, %v208_v13  }
  0xaf   : > { %v210_v24 = vmul.f32 1.442695, %v209_v14 }
  0xb4   : > { %v243_v36 = vld [vmem:[#allocation2] sm:$0xff] }
 0x12c   : > { %v215_v15 = vpop.permute.xlu0 %214 }
 0x12d   : > { %v217_v16 = vsub.f32 %v202_v6, %v215_v15 }
 0x12f   : > { %v218_v17 = vmul.f32 1.442695, %v217_v16 }
 0x131   : > { %438 = vpow2.f32 %v218_v17 }
 0x132   : > { %440 = vpow2.f32 %v210_v24 }
 0x13b   : > { %v439_v20 = vpop.eup %438 }
 0x13c   : > { %v220_v22 = vsel %vm203_vm1, %v439_v20, 0.0  ;;  %v441_v25 = vpop.eup %440 }
 0x13d   : > { %221 = vadd.xlane.f32.xlu1 %v220_v22  ;;  %v224_v27 = vmul.f32 %v441_v25, %v223_v26 }
 0x141   : > { %236 = vadd.xlane.f32.xlu1 %v235_v23 }
 0x1ca   : > { %v222_v28 = vpop.xlane.xlu1 %221 }
 0x1cb   : > { %v225_v29 = vadd.f32 %v224_v27, %v222_v28 }
 0x1cd   : > { %227 = vst.msk [vmem:[#allocation3] sm:$0xff] %vm183_vm0, %v225_v29 }
 0x1ce   : > { %v237_v31 = vpop.xlane.xlu1 %236 }
 0x1cf   : > { %v238_v32 = vadd.f32 %v237_v31, %v234_v30 }
 0x1d1   : > { %239 = vst.msk [vmem:[#allocation4] sm:$0xff] %vm183_vm0, %v238_v32 }
 0x1d4   : > { %v244_v33 = vld [vmem:[#allocation3] sm:$0xff] }
 0x1d5   : > { %442 = vlog2.f32 %v244_v33 }
 0x1d8   : > { %v248_v37 = vld [vmem:[#allocation4] sm:$0xff] }
 0x1df   : > { %v443_v34 = vpop.eup %442 }
 0x1e0   : > { %v246_v35 = vmul.f32 0.6931472, %v443_v34 }
 0x1e2   : > { %v247_v38 = vadd.f32 %v246_v35, %v243_v36 }
 0x1e4   : > { %v249_v39 = vsub.f32 %v247_v38, %v248_v37 }
 0x1e6   : > { %v250_v40 = vsel %vm199_vm2, %v249_v39, 0.0 }
 0x1e7   : > { %v251_v41 = vsel %vm183_vm0, %v250_v40, 0.0 }
 0x1e8   : > { %252 = vadd.xlane.f32.xlu1 %v251_v41 }
 0x275   : > { %v253_v42 = vpop.xlane.xlu1 %252 }
 0x276   : > { %v254_v43 = vrot.slane %v253_v42, 4 }
 0x278   : > { %v255_v44 = vadd.f32 %v254_v43, %v253_v42 }
 0x27a   : > { %v256_v45 = vrot.slane %v255_v44, 2 }
 0x27c   : > { %v257_v46 = vadd.f32 %v256_v45, %v255_v44 }
 0x27e   : > { %v258_v47 = vrot.slane %v257_v46, 1 }
 0x280   : > { %v259_v48 = vadd.f32 %v258_v47, %v257_v46 }
 0x282   : > { %376 = vpush %v259_v48 }
 0x2b3   : > { %s377_s15 = spop %376 }
 0x2b4   : > { %v264_v49 = vstv %s377_s15 }
 0x2b5   : > { %v265_v50 = vsel %vm263_vm6, %v264_v49, 0.0 }
 0x2b6   : > { %266 = vst [vmem:[%s167_s7] sm:$0xff] %v265_v50 }
 0x2b7   : > { %457 = shalt.err (!%p454_p5)
}
 0x2b8   : > { %s458_s27 = scalar_lea.hbm %s628_s20, 128  ;;  %s462_s30 = scalar_lea.hbm %s677_s2, 384 }
 0x2b9   : > { %p459_p6 = scmp.ne.s32.totalorder %s628_s20, %s458_s27  ;;  %p463_p10 = scmp.lt.u32.totalorder %s628_s20, %s677_s2 }
 0x2ba   : > { %p464_p11 = scmp.lt.u32.totalorder %s462_s30, %s458_s27  ;;  %p466_p13 = scmp.lt.u32.totalorder %s458_s27, %s628_s20 }
 0x2bb   : > { %p460_p7 = pnand %p459_p6, %p583_p4 }
 0x2bc   : > { %p465_p12 = por %p464_p11, %p463_p10 }
 0x2bd   : > { %p461_p9 = pneg %p460_p7 }
 0x2be   : > { %p467_p0 = por %p466_p13, %p465_p12 }
 0x2c0   : > { %p468_p1 = pnand %p467_p0, %p461_p9 }
 0x2c2   : > { %471 = shalt.err (!%p468_p1)
}
 0x2c3   : > { %378 = dma.vmem_to_hbm [thread:$0]  (%p583_p4), %s630_s8, 128, %s628_s20, %s268_s23  }
 0x2c4 PF: > { %p384_p2 = scmp.ge.s32.totalorder %s522_s14, 2  ;;  %s293_s5 = sand.u32 1, %s502_s9  }
 0x2c5   : > { %s294_s6 = scalar_lea.sflag [#allocation6], %s293_s5 }
 0x2c6   : > { %p381_p3 = pnand %p384_p2, %p590_p8 }
 0x2c8   : > { %497 = dma.done.wait (!%p381_p3), %s294_s6, 128  }
 0x2c9   : > { %499 = vsyncadd (!%p381_p3), %s294_s6, 4294967168  ;;  %s15_s14 = sadd.s32 1, %s522_s14   ;;  %s680_s9 = smov %s506_s10 }
 0x2ca   : > { %p12_p5 = scmp.ge.s32.totalorder %s15_s14, 5   ;;  %s681_s10 = smov %s510_s11 }
 0x2cb   : > { %s682_s11 = smov %s596_s22  ;;  %s683_s12 = smov %s518_s13 }
 0x2cc   : > { %s684_s13 = smov %s686_s17  ;;  %14 = sbr.rel (!%p12_p5) target bundleno = 4 (0x4), region = 74 }
 0x2d3   :  { %299 = vsyncpa [#allocation6], 1 }
 0x2d4   :  { %301 = vsyncpa [#allocation6 + $0x1], 1 }

</bundles_post_ra>
